<compile_context>
chip_gen: v7x
topology: tpu7x:2x2x1
jax: 0.10.0
libtpu: 0.0.40
codegen_flags: <defaults>
</compile_context>

<pallas_src>
import jax
import jax.numpy as jnp
from jax.experimental import pallas as pl
from jax.experimental.pallas import tpu as pltpu


_SMALL_C_THRESHOLD = 16   # at or below this, skip the MXU and use VPU MACs
_TARGET_TILE = 4096       # target lane-width of one spatial tile


def _conv1x1_mac_kernel(w_ref, b_ref, x_ref, o_ref):
    """VPU path for tiny channel counts.

    w_ref: (Cout, C)   f32 in SMEM (scalar reads)
    b_ref: (Cout, 1)   f32 in SMEM
    x_ref: (1, C, T)   VMEM block (T = spatial tile on the lane dim)
    o_ref: (1, Cout, T) VMEM block
    """
    cin = x_ref.shape[1]
    cout = o_ref.shape[1]
    # Hoist the input rows once; they are reused for every output channel.
    rows = [x_ref[0, ci:ci + 1, :].astype(jnp.float32) for ci in range(cin)]
    for co in range(cout):
        acc = w_ref[co, 0] * rows[0]
        for ci in range(1, cin):
            acc = acc + w_ref[co, ci] * rows[ci]
        o_ref[0, co:co + 1, :] = (acc + b_ref[co, 0]).astype(o_ref.dtype)


def _conv1x1_dot_kernel(w_ref, b_ref, x_ref, o_ref):
    """MXU path for real channel counts.

    w_ref: (Cout, C) VMEM, b_ref: (Cout, 1) VMEM,
    x_ref: (1, C, T) VMEM, o_ref: (1, Cout, T) VMEM.
    """
    acc = jnp.dot(
        w_ref[...],
        x_ref[0],
        preferred_element_type=jnp.float32,
        precision=jax.lax.Precision.HIGHEST,
    )
    o_ref[0] = (acc + b_ref[...]).astype(o_ref.dtype)


def conv1x1_channel_major(x_flat, weight, bias, *, target_tile=_TARGET_TILE):
    """Channel-major 1x1 conv.

    x_flat: (B, C, HW)  -- NCHW with the spatial dims flattened (free reshape)
    weight: (Cout, C)   -- squeezed PyTorch Conv2d 1x1 weight
    bias:   (Cout,)
    returns (B, Cout, HW)
    """
    B, C, HW = x_flat.shape
    Cout = weight.shape[0]

    # Lane tile: full HW if small (always layout-legal), else lane-aligned big
    # tile with a padded/masked last block.
    if HW <= target_tile:
        tile = HW
    else:
        tile = (target_tile // 128) * 128
    n_tiles = pl.cdiv(HW, tile)

    weight = weight.astype(jnp.float32)
    bias2d = bias.reshape(Cout, 1).astype(jnp.float32)

    use_mac = C <= _SMALL_C_THRESHOLD
    if use_mac:
        kernel = _conv1x1_mac_kernel
        w_spec = pl.BlockSpec(memory_space=pltpu.MemorySpace.SMEM)
        b_spec = pl.BlockSpec(memory_space=pltpu.MemorySpace.SMEM)
    else:
        kernel = _conv1x1_dot_kernel
        w_spec = pl.BlockSpec((Cout, C), lambda b, t: (0, 0))
        b_spec = pl.BlockSpec((Cout, 1), lambda b, t: (0, 0))

    # VMEM budget: double-buffered input + output tiles (+ weights/bias),
    # capped at 48 MiB so the same sizing is safe on v7x (64 MiB VMEM).
    itemsize = 4
    need = 2 * (C * tile + Cout * tile) * itemsize + (Cout * C + Cout) * itemsize
    vmem_limit = int(min(max(2 * need, 32 * 1024 * 1024), 48 * 1024 * 1024))

    return pl.pallas_call(
        kernel,
        out_shape=jax.ShapeDtypeStruct((B, Cout, HW), x_flat.dtype),
        grid_spec=pltpu.PrefetchScalarGridSpec(
            num_scalar_prefetch=0,
            grid=(B, n_tiles),
            in_specs=[
                w_spec,
                b_spec,
                pl.BlockSpec((1, C, tile), lambda b, t: (b, 0, t)),
            ],
            out_specs=pl.BlockSpec((1, Cout, tile), lambda b, t: (b, 0, t)),
        ),
        compiler_params=pltpu.CompilerParams(
            dimension_semantics=("parallel", "parallel"),
            vmem_limit_bytes=vmem_limit,
        ),
    )(weight, bias2d, x_flat)


@jax.jit
def dark_upsample_forward(x, low_level_features, weight, bias):
    """x: (B, C, H, W) NCHW; low_level_features: (B2, C//2, 2H, 2W) NCHW.

    weight: (Cout=C//2, Cin=C) or raw PyTorch (Cout, Cin, 1, 1); bias: (Cout,).
    Returns (B + B2, C//2, 2H, 2W) NCHW.
    """
    B, C, H, W = x.shape
    if weight.ndim == 4:  # accept unsqueezed PyTorch 1x1 conv weight
        weight = weight.reshape(weight.shape[0], weight.shape[1])
    Cout = weight.shape[0]
    assert weight.shape[1] == C, "1x1 conv weight must be (Cout, Cin[, 1, 1])"

    # 1x1 conv at the ORIGINAL resolution (commutes exactly with nearest x2).
    x_flat = x.reshape(B, C, H * W)                      # free NCHW reshape
    y_flat = conv1x1_channel_major(x_flat, weight, bias)  # (B, Cout, H*W)
    y = y_flat.reshape(B, Cout, H, W)

    # Nearest upsample x2 of the (smaller) conv output: one fused
    # broadcast+reshape pass in XLA.
    y_up = jnp.broadcast_to(
        y[:, :, :, None, :, None], (B, Cout, H, 2, W, 2)
    ).reshape(B, Cout, 2 * H, 2 * W)

    # TODO(synk): fuse the 2x2 replication and the dim=0 concat into the Pallas
    # output write (aliased combined output buffer) to save one more HBM pass.
    return jnp.concatenate([y_up, low_level_features], axis=0)


if __name__ == "__main__":
    key = jax.random.PRNGKey(0)
    k_x, k_low, k_w, k_b, k_x2, k_low2, k_w2, k_b2 = jax.random.split(key, 8)

    def reference(x, low, weight, bias):
        x_up = jnp.repeat(jnp.repeat(x, 2, axis=2), 2, axis=3)
        conv = jnp.einsum(
            "bchw,oc->bohw", x_up, weight, precision=jax.lax.Precision.HIGHEST
        ) + bias[None, :, None, None]
        return jnp.concatenate([conv, low], axis=0)

    # ---- test 1: tiny channel count (VPU MAC path), module demo shapes ----
    B, C, H, W = 2, 4, 16, 16
    Cout = C // 2
    x = jax.random.normal(k_x, (B, C, H, W), dtype=jnp.float32)
    low = jax.random.normal(k_low, (B, Cout, 2 * H, 2 * W), dtype=jnp.float32)
    bound = 1.0 / jnp.sqrt(jnp.float32(C))
    weight = jax.random.uniform(k_w, (Cout, C), jnp.float32, -bound, bound)
    bias = jax.random.uniform(k_b, (Cout,), jnp.float32, -bound, bound)

    out = jax.block_until_ready(dark_upsample_forward(x, low, weight, bias))
    ref = reference(x, low, weight, bias)
    assert out.shape == (2 * B, Cout, 2 * H, 2 * W)
    assert jnp.allclose(out, ref, atol=1e-5, rtol=1e-5)

    # ---- test 2: larger channel count (MXU dot path) ----
    B2, C2, H2, W2 = 2, 256, 8, 8
    Cout2 = C2 // 2
    x2 = jax.random.normal(k_x2, (B2, C2, H2, W2), dtype=jnp.float32)
    low2 = jax.random.normal(
        k_low2, (B2, Cout2, 2 * H2, 2 * W2), dtype=jnp.float32
    )
    bound2 = 1.0 / jnp.sqrt(jnp.float32(C2))
    weight2 = jax.random.uniform(k_w2, (Cout2, C2), jnp.float32, -bound2, bound2)
    bias2 = jax.random.uniform(k_b2, (Cout2,), jnp.float32, -bound2, bound2)

    out2 = jax.block_until_ready(dark_upsample_forward(x2, low2, weight2, bias2))
    ref2 = reference(x2, low2, weight2, bias2)
    assert out2.shape == (2 * B2, Cout2, 2 * H2, 2 * W2)
    assert jnp.allclose(out2, ref2, atol=1e-3, rtol=1e-3)

    print("KERNEL_OK")
</pallas_src>

<mosaic_0001>
module attributes {stable_mosaic.version = 11 : i64} {
  func.func @_conv1x1_mac_kernel(%arg0: i32, %arg1: i32, %arg2: memref<2x4xf32, #tpu.memory_space<smem>>, %arg3: memref<2x1xf32, #tpu.memory_space<smem>>, %arg4: memref<1x4x256xf32, #tpu.memory_space<vmem>>, %arg5: memref<1x2x256xf32, #tpu.memory_space<vmem>>) attributes {dimension_semantics = [#tpu.dimension_semantics<parallel>, #tpu.dimension_semantics<parallel>], iteration_bounds = array<i64: 2, 1>, scalar_prefetch = 0 : i64, scratch_operands = 0 : i64, tpu.core_type = #tpu.core_type<tc>, window_params = [{transform_indices = @transform_0, window_bounds = array<i64: 2, 4>}, {transform_indices = @transform_1, window_bounds = array<i64: 2, 1>}, {transform_indices = @transform_2, window_bounds = array<i64: 1, 4, 256>}, {transform_indices = @transform_3, window_bounds = array<i64: 1, 2, 256>}]} {
    %c0 = arith.constant 0 : index
    %c0_0 = arith.constant 0 : index
    %c0_1 = arith.constant 0 : index
    %0 = vector.load %arg4[%c0, %c0_0, %c0_1] : memref<1x4x256xf32, #tpu.memory_space<vmem>>, vector<1x1x256xf32>
    %1 = vector.shape_cast %0 : vector<1x1x256xf32> to vector<1x256xf32>
    %c0_2 = arith.constant 0 : index
    %c1 = arith.constant 1 : index
    %c0_3 = arith.constant 0 : index
    %2 = vector.load %arg4[%c0_2, %c1, %c0_3] : memref<1x4x256xf32, #tpu.memory_space<vmem>>, vector<1x1x256xf32>
    %3 = vector.shape_cast %2 : vector<1x1x256xf32> to vector<1x256xf32>
    %c0_4 = arith.constant 0 : index
    %c2 = arith.constant 2 : index
    %c0_5 = arith.constant 0 : index
    %4 = vector.load %arg4[%c0_4, %c2, %c0_5] : memref<1x4x256xf32, #tpu.memory_space<vmem>>, vector<1x1x256xf32>
    %5 = vector.shape_cast %4 : vector<1x1x256xf32> to vector<1x256xf32>
    %c0_6 = arith.constant 0 : index
    %c3 = arith.constant 3 : index
    %c0_7 = arith.constant 0 : index
    %6 = vector.load %arg4[%c0_6, %c3, %c0_7] : memref<1x4x256xf32, #tpu.memory_space<vmem>>, vector<1x1x256xf32>
    %7 = vector.shape_cast %6 : vector<1x1x256xf32> to vector<1x256xf32>
    %c0_8 = arith.constant 0 : index
    %c0_9 = arith.constant 0 : index
    %8 = memref.load %arg2[%c0_8, %c0_9] : memref<2x4xf32, #tpu.memory_space<smem>>
    %9 = vector.broadcast %8 : f32 to vector<1x256xf32>
    %10 = arith.mulf %9, %1 : vector<1x256xf32>
    %c0_10 = arith.constant 0 : index
    %c1_11 = arith.constant 1 : index
    %11 = memref.load %arg2[%c0_10, %c1_11] : memref<2x4xf32, #tpu.memory_space<smem>>
    %12 = vector.broadcast %11 : f32 to vector<1x256xf32>
    %13 = arith.mulf %12, %3 : vector<1x256xf32>
    %14 = arith.addf %10, %13 : vector<1x256xf32>
    %c0_12 = arith.constant 0 : index
    %c2_13 = arith.constant 2 : index
    %15 = memref.load %arg2[%c0_12, %c2_13] : memref<2x4xf32, #tpu.memory_space<smem>>
    %16 = vector.broadcast %15 : f32 to vector<1x256xf32>
    %17 = arith.mulf %16, %5 : vector<1x256xf32>
    %18 = arith.addf %14, %17 : vector<1x256xf32>
    %c0_14 = arith.constant 0 : index
    %c3_15 = arith.constant 3 : index
    %19 = memref.load %arg2[%c0_14, %c3_15] : memref<2x4xf32, #tpu.memory_space<smem>>
    %20 = vector.broadcast %19 : f32 to vector<1x256xf32>
    %21 = arith.mulf %20, %7 : vector<1x256xf32>
    %22 = arith.addf %18, %21 : vector<1x256xf32>
    %c0_16 = arith.constant 0 : index
    %c0_17 = arith.constant 0 : index
    %23 = memref.load %arg3[%c0_16, %c0_17] : memref<2x1xf32, #tpu.memory_space<smem>>
    %24 = vector.broadcast %23 : f32 to vector<1x256xf32>
    %25 = arith.addf %22, %24 : vector<1x256xf32>
    %c0_18 = arith.constant 0 : index
    %c0_19 = arith.constant 0 : index
    %c0_20 = arith.constant 0 : index
    %26 = vector.load %arg5[%c0_18, %c0_19, %c0_20] : memref<1x2x256xf32, #tpu.memory_space<vmem>>, vector<1x1x256xf32>
    %27 = vector.shape_cast %26 : vector<1x1x256xf32> to vector<1x256xf32>
    %28 = vector.shape_cast %25 : vector<1x256xf32> to vector<1x1x256xf32>
    tpu.vector_store %arg5[%c0_18, %c0_19, %c0_20], %28 {strides = array<i32>} : memref<1x2x256xf32, #tpu.memory_space<vmem>>, vector<1x1x256xf32>,
    %c1_21 = arith.constant 1 : index
    %c0_22 = arith.constant 0 : index
    %29 = memref.load %arg2[%c1_21, %c0_22] : memref<2x4xf32, #tpu.memory_space<smem>>
    %30 = vector.broadcast %29 : f32 to vector<1x256xf32>
    %31 = arith.mulf %30, %1 : vector<1x256xf32>
    %c1_23 = arith.constant 1 : index
    %c1_24 = arith.constant 1 : index
    %32 = memref.load %arg2[%c1_23, %c1_24] : memref<2x4xf32, #tpu.memory_space<smem>>
    %33 = vector.broadcast %32 : f32 to vector<1x256xf32>
    %34 = arith.mulf %33, %3 : vector<1x256xf32>
    %35 = arith.addf %31, %34 : vector<1x256xf32>
    %c1_25 = arith.constant 1 : index
    %c2_26 = arith.constant 2 : index
    %36 = memref.load %arg2[%c1_25, %c2_26] : memref<2x4xf32, #tpu.memory_space<smem>>
    %37 = vector.broadcast %36 : f32 to vector<1x256xf32>
    %38 = arith.mulf %37, %5 : vector<1x256xf32>
    %39 = arith.addf %35, %38 : vector<1x256xf32>
    %c1_27 = arith.constant 1 : index
    %c3_28 = arith.constant 3 : index
    %40 = memref.load %arg2[%c1_27, %c3_28] : memref<2x4xf32, #tpu.memory_space<smem>>
    %41 = vector.broadcast %40 : f32 to vector<1x256xf32>
    %42 = arith.mulf %41, %7 : vector<1x256xf32>
    %43 = arith.addf %39, %42 : vector<1x256xf32>
    %c1_29 = arith.constant 1 : index
    %c0_30 = arith.constant 0 : index
    %44 = memref.load %arg3[%c1_29, %c0_30] : memref<2x1xf32, #tpu.memory_space<smem>>
    %45 = vector.broadcast %44 : f32 to vector<1x256xf32>
    %46 = arith.addf %43, %45 : vector<1x256xf32>
    %c0_31 = arith.constant 0 : index
    %c1_32 = arith.constant 1 : index
    %c0_33 = arith.constant 0 : index
    %47 = vector.load %arg5[%c0_31, %c1_32, %c0_33] : memref<1x2x256xf32, #tpu.memory_space<vmem>>, vector<1x1x256xf32>
    %48 = vector.shape_cast %47 : vector<1x1x256xf32> to vector<1x256xf32>
    %49 = vector.shape_cast %46 : vector<1x256xf32> to vector<1x1x256xf32>
    tpu.vector_store %arg5[%c0_31, %c1_32, %c0_33], %49 {strides = array<i32>} : memref<1x2x256xf32, #tpu.memory_space<vmem>>, vector<1x1x256xf32>,
    return
  }
  func.func @transform_0(%arg0: i32, %arg1: i32) -> (i32, i32) {
    %c0_i32 = arith.constant 0 : i32
    %c0_i32_0 = arith.constant 0 : i32
    %c0_i32_1 = arith.constant 0 : i32
    return %c0_i32, %c0_i32_0 : i32, i32
  }
  func.func @transform_1(%arg0: i32, %arg1: i32) -> (i32, i32) {
    %c0_i32 = arith.constant 0 : i32
    %c0_i32_0 = arith.constant 0 : i32
    %c0_i32_1 = arith.constant 0 : i32
    return %c0_i32, %c0_i32_0 : i32, i32
  }
  func.func @transform_2(%arg0: i32, %arg1: i32) -> (i32, i32, i32) {
    %c0_i32 = arith.constant 0 : i32
    %c0_i32_0 = arith.constant 0 : i32
    return %arg0, %c0_i32, %arg1 : i32, i32, i32
  }
  func.func @transform_3(%arg0: i32, %arg1: i32) -> (i32, i32, i32) {
    %c0_i32 = arith.constant 0 : i32
    %c0_i32_0 = arith.constant 0 : i32
    return %arg0, %c0_i32, %arg1 : i32, i32, i32
  }
}

</mosaic_0001>

<bundles_post_ra>
// kernel: dark_upsample_forward.1
= control target key start
LH: loop header
LB: loop body
LE: loop exit
PB: predicated region body
PF: predicated region fallthrough
CT: control target
= control target key end

     0   :  { %8 = vsyncpa [#allocation3], 0  ;;  %s645_s0 = inlined_call_operand.vmem [shape: f32[2,4], index: 0, kind: input, shape index: {}]   ;;  %s646_s1 = inlined_call_operand.vmem [shape: f32[2,1], index: 1, kind: input, shape index: {}]   ;;  %s647_s2 = inlined_call_operand.vmem [shape: f32[2,4,256], index: 2, kind: input, shape index: {}]   ;;  %s648_s3 = inlined_call_operand.vmem [shape: f32[2,2,256], index: 3, kind: output, shape index: {}]  }
   0x1   :  { %9 = vsyncpa [#allocation5], 0  ;;  %s554_s12 = smov 0   ;;  %s556_s13 = smov 0  }
   0x2   :  { %s558_s14 = smov 0  }
   0x3 LB: > { %s396_s15 = sadd.s32 4294967295, %s530_s14   ;;  %s27_s16 = sadd.s32 1, %s526_s13  ;;  %s530_s14 = sphi %s558_s14, %s15_s14   ;;  %s526_s13 = sphi %s556_s13, %s660_s13   ;;  %s522_s12 = sphi %s554_s12, %s659_s12  }
   0x4   : > { %p29_p0 = scmp.ge.s32.totalorder %s27_s16, 2  ;;  %p398_p1 = scmp.ge.s32.totalorder %s530_s14, 1 }
   0x5   : > { %p130_p2 = scmp.lt.s32.totalorder %s530_s14, 3  ;;  %p579_p4 = scmp.eq.s32.totalorder %s396_s15, 0 }
   0x6   : > { %s662_s16 = smov (%p29_p0, %s27_s16), 0  ;;  %s143_s21 = sshll.u32 %s645_s0, 4  ;;  %s144_s21 = int_to_ptr.vmem [resolvable:$true] %s143_s21 }
   0x7   : > { %p575_p3 = pnand %p398_p1, %p130_p2  ;;  %s154_s24 = sshll.u32 %s646_s1, 4  ;;  %s155_s24 = int_to_ptr.vmem [resolvable:$true] %s154_s24 }
   0x8   : > { %s653_s18 = scalar_select %p579_p4, 1, 0 }
   0x9   : > { %s652_s17 = scalar_select %p575_p3, 1, 0 }
   0xa   : > { %p433_p5 = pneg %p575_p3  ;;  %s470_s26 = scalar_lea.vmem %s144_s21, 32 }
   0xb   : > { %p471_p7 = scmp.ne.s32.totalorder %s144_s21, %s470_s26  ;;  %p478_p11 = scmp.lt.s32.totalorder %s144_s21, %s144_s21 }
   0xc   : > { %p593_p6 = pnand %p579_p4, %p433_p5  ;;  %p479_p12 = scmp.lt.s32.totalorder %s470_s26, %s470_s26 }
   0xe   : > { %p472_p8 = pneg %p593_p6  ;;  %p480_p13 = por %p479_p12, %p478_p11 }
  0x10   : > { %p473_p9 = pnand %p472_p8, %p471_p7 }
  0x12   : > { %p474_p10 = pneg %p473_p9 }
  0x14   : > { %p481_p0 = pnand %p480_p13, %p474_p10 }
  0x16   : > { %484 = shalt.err (!%p481_p0)
}
  0x17   : > { %s532_s27 = smov [#allocation2]   ;;  %s485_s28 = scalar_lea.vmem %s155_s24, 32 }
  0x18   : > { %436 = dma.vmem_to_smem (!%p593_p6), %s144_s21, 32, %s532_s27, [#allocation3]  }
  0x19   : > { %p486_p1 = scmp.ne.s32.totalorder %s155_s24, %s485_s28  ;;  %p493_p4 = scmp.lt.s32.totalorder %s155_s24, %s155_s24 }
  0x1a   : > { %p494_p3 = scmp.lt.s32.totalorder %s485_s28, %s485_s28 }
  0x1b   : > { %p488_p2 = pnand %p486_p1, %p472_p8 }
  0x1c   : > { %p495_p7 = por %p494_p3, %p493_p4 }
  0x1d   : > { %p489_p5 = pneg %p488_p2 }
  0x1f   : > { %p496_p9 = pnand %p495_p7, %p489_p5 }
  0x21   : > { %499 = shalt.err (!%p496_p9)
}
  0x22   : > { %s533_s29 = smov [#allocation4]   ;;  %p655_p10 = scmp.ne.s32.totalorder %s652_s17, 0 }
  0x23   : > { %439 = dma.vmem_to_smem (!%p593_p6), %s155_s24, 32, %s533_s29, [#allocation5]  }
  0x24   : > { %180 = sbr.rel (%p655_p10) target bundleno = 73 (0x49), region = 32  ;;  %p656_p11 = scmp.ne.s32.totalorder (!%p655_p10), %s653_s18, 0 }
  0x2b   : > { %513 = dma.done.wait (%p656_p11), [#allocation3], 32  }
  0x2c   : > { %515 = vsyncadd (%p656_p11), [#allocation3], 4294967264 }
  0x2d   : > { %517 = dma.done.wait (%p656_p11), [#allocation5], 32  }
  0x2e   : > { %519 = vsyncadd (%p656_p11), [#allocation5], 4294967264 }
  0x2f   : > { %190 = sfence }
  0x30   : > { %p218_p3 = scmp.lt.s32.totalorder %s522_s12, 1  ;;  %s244_s30 = sld [smem:[#allocation2]]  ;;  %v262_v13 = vlaneseq }
  0x31   : > { %s412_s4 = sld [smem:[#allocation2 + $0x1]]  ;;  %s413_s5 = sld [smem:[#allocation2 + $0x2]] }
  0x32   : > { %s664_s12 = smov (!%p218_p3, %s522_s12), 1  ;;  %s414_s6 = sld [smem:[#allocation2 + $0x3]]  ;;  %vm625_vm0 = vcmp.lt.s32.totalorder %v262_v13, 256 }
  0x33   : > { %s423_s7 = sshll.u32 %s664_s12, 3  ;;  %s621_s11 = sld [smem:[#allocation4]] }
  0x34   : > { %s225_s10 = scalar_lea.vmem %s647_s2, %s423_s7  ;;  %s415_s15 = sld [smem:[#allocation2 + $0x80]] }
  0x35   : > { %v237_v0 = vld [vmem:[%s225_s10] ss:$4 sm:$0x3]  ;;  %v409_v1 = vld [vmem:[%s225_s10 + $0x1] ss:$4 sm:$0x3] }
  0x36   : > { %v245_v2 = vstv %s244_s30  ;;  %v410_v3 = vld [vmem:[%s225_s10 + $0x2] ss:$4 sm:$0x3]  ;;  %v411_v4 = vld [vmem:[%s225_s10 + $0x3] ss:$4 sm:$0x3] }
  0x37   : > { %v246_v5 = vmul.f32 %v245_v2, %v237_v0  ;;  %v248_v6 = vstv %s412_s4  ;;  %v252_v7 = vstv %s413_s5  ;;  %s416_s17 = sld [smem:[#allocation2 + $0x81]]  ;;  %s417_s18 = sld [smem:[#allocation2 + $0x82]] }
  0x38   : > { %v249_v8 = vmul.f32 %v409_v1, %v248_v6  ;;  %v253_v9 = vmul.f32 %v410_v3, %v252_v7  ;;  %v256_v10 = vstv %s414_s6  ;;  %s418_s19 = sld [smem:[#allocation2 + $0x83]]  ;;  %s424_s20 = sshll.u32 %s664_s12, 2 }
  0x39   : > { %v257_v12 = vmul.f32 %v411_v4, %v256_v10  ;;  %s419_s21 = sld [smem:[#allocation4 + $0x80]]  ;;  %v260_v15 = vstv %s621_s11  ;;  %s235_s24 = scalar_lea.vmem %s648_s3, %s424_s20 }
  0x3a   : > { %v250_v11 = vadd.f32 %v249_v8, %v246_v5  ;;  %v268_v18 = vstv %s415_s15 }
  0x3b   : > { %v269_v20 = vmul.f32 %v268_v18, %v237_v0 }
  0x3c   : > { %v254_v14 = vadd.f32 %v253_v9, %v250_v11 }
  0x3d   : > { %v271_v19 = vstv %s416_s17  ;;  %v275_v22 = vstv %s417_s18 }
  0x3e   : > { %v258_v16 = vadd.f32 %v257_v12, %v254_v14  ;;  %v272_v21 = vmul.f32 %v409_v1, %v271_v19  ;;  %v279_v23 = vstv %s418_s19  ;;  %v276_v25 = vmul.f32 %v410_v3, %v275_v22 }
  0x3f   : > { %v280_v27 = vmul.f32 %v411_v4, %v279_v23  ;;  %v283_v29 = vstv %s419_s21 }
  0x40   : > { %v261_v24 = vadd.f32 %v260_v15, %v258_v16  ;;  %v273_v26 = vadd.f32 %v272_v21, %v269_v20 }
  0x42   : > { %266 = vst.msk [vmem:[%s235_s24] ss:$2 sm:$0x3] %vm625_vm0, %v261_v24  ;;  %v277_v28 = vadd.f32 %v276_v25, %v273_v26 }
  0x44   : > { %v281_v30 = vadd.f32 %v280_v27, %v277_v28 }
  0x46   : > { %v284_v31 = vadd.f32 %v283_v29, %v281_v30 }
  0x48   : > { %420 = vst.msk [vmem:[%s235_s24 + $0x1] ss:$2 sm:$0x3] %vm625_vm0, %v284_v31 }
  0x49 PF: > { %s15_s14 = sadd.s32 1, %s530_s14   ;;  %s659_s12 = smov %s526_s13 }
  0x4a   : > { %p12_p4 = scmp.ge.s32.totalorder %s15_s14, 4   ;;  %s660_s13 = smov %s662_s16 }
  0x4c   :  { %14 = sbr.rel (!%p12_p4) target bundleno = 3 (0x3), region = 75 }
  0x53   :  { %317 = vsyncpa [#allocation3], 1 }
  0x54   :  { %319 = vsyncpa [#allocation3 + $0x1], 1 }
  0x55   :  { %320 = vsyncpa [#allocation5], 1 }

</bundles_post_ra>
